<compile_context>
chip_gen: v7x
topology: tpu7x:2x2x1
jax: 0.10.0
libtpu: 0.0.40
codegen_flags: <defaults>
</compile_context>

<pallas_src>
import functools

import jax
import jax.numpy as jnp
from jax.experimental import pallas as pl
from jax.experimental.pallas import tpu as pltpu

_LANES = 128
_ACC_ROWS = 512                          # fixed VMEM accumulator height (rows)
_TARGET_BLOCK_BYTES = 4 * 1024 * 1024    # ~4 MiB per input per grid step


def _round_down(a, b):
    return a // b * b


@functools.lru_cache(maxsize=1)
def _num_tensorcores():
    """Best-effort TensorCores-per-chip (1 on v5e/v6e, 2 on megacore parts)."""
    try:
        info = pltpu.get_tpu_info()
    except Exception:
        return 1
    for attr in ("num_cores", "num_tensorcores", "tensorcores_per_chip",
                 "cores_per_chip", "num_cores_per_chip"):
        v = getattr(info, attr, None)
        if isinstance(v, int) and v in (1, 2):
            return v
    return 1


def _rmse_partial_kernel(x_ref, y_ref, o_ref, acc_ref, *,
                         rows, tile_rows, acc_rows, blocks_per_shard,
                         needs_row_mask):
    p = pl.program_id(0)   # shard axis (TensorCores on multi-TC chips)
    i = pl.program_id(1)   # block-within-shard axis (reduction, last)

    @pl.when(i == 0)
    def _init():
        acc_ref[...] = jnp.zeros_like(acc_ref)

    blk = p * blocks_per_shard + i
    # Valid rows remaining in this block (<= 0 for clamped duplicate blocks).
    # Computed in row units -> no int32 overflow even for huge inputs.
    valid_rows = rows - blk * tile_rows

    n_chunks = tile_rows // acc_rows

    def accum_chunk(xs, ys, chunk_valid):
        xv = xs.astype(jnp.float32)
        yv = ys.astype(jnp.float32)
        d = xv - yv
        d2 = d * d
        if needs_row_mask:
            # Fast mask-free path for fully-valid chunks; only the tail chunk
            # (and fully-out-of-range duplicate chunks) pays the mask cost.
            @pl.when(chunk_valid >= acc_rows)
            def _full():
                acc_ref[...] += d2

            @pl.when(chunk_valid < acc_rows)
            def _tail():
                rid = jax.lax.broadcasted_iota(jnp.int32, (acc_rows, _LANES), 0)
                acc_ref[...] += jnp.where(rid < chunk_valid, d2, 0.0)
        else:
            acc_ref[...] += d2

    if n_chunks == 1:
        accum_chunk(x_ref[...], y_ref[...], valid_rows)
    else:
        @pl.loop(0, n_chunks)
        def _chunks(c):
            r0 = pl.multiple_of(c * acc_rows, acc_rows)
            accum_chunk(x_ref[pl.ds(r0, acc_rows), :],
                        y_ref[pl.ds(r0, acc_rows), :],
                        valid_rows - c * acc_rows)

    @pl.when(i == pl.num_programs(1) - 1)
    def _finish():
        # Single cross-lane reduce per shard, once at the very end.
        o_ref[0, 0] = jnp.sum(acc_ref[...])


def _rmse_sum_sq(x2, y2, rows):
    """Sum of squared differences over a lane-dense [rows, 128] view."""
    max_itemsize = max(x2.dtype.itemsize, y2.dtype.itemsize)
    max_tile_rows = max(
        _ACC_ROWS,
        _round_down(_TARGET_BLOCK_BYTES // (_LANES * max_itemsize), _ACC_ROWS))

    if rows < _ACC_ROWS:
        # Single block equal to the full row extent (always a legal block).
        tile_rows = rows
        acc_rows = rows
    else:
        tile_rows = min(max_tile_rows, _round_down(rows, _ACC_ROWS))
        acc_rows = _ACC_ROWS

    total_blocks = -(-rows // tile_rows)

    # Shard across TensorCores only when the chip actually has two of them.
    shards = 2 if (_num_tensorcores() >= 2 and total_blocks >= 2) else 1

    def launch(n_shards):
        blocks_per_shard = -(-total_blocks // n_shards)
        needs_row_mask = (rows % tile_rows != 0) or (
            n_shards * blocks_per_shard != total_blocks)

        def in_map(pidx, iidx):
            blk = pidx * blocks_per_shard + iidx
            # Clamp duplicate overshoot blocks (ceil-div sharding) so they
            # never index past the array; their contribution is masked to 0.
            return (jnp.minimum(blk, total_blocks - 1), 0)

        kernel = functools.partial(
            _rmse_partial_kernel,
            rows=rows, tile_rows=tile_rows, acc_rows=acc_rows,
            blocks_per_shard=blocks_per_shard, needs_row_mask=needs_row_mask)

        item_bytes = x2.dtype.itemsize + y2.dtype.itemsize
        vmem_limit = int(2 * tile_rows * _LANES * item_bytes   # dbl-buffered inputs
                         + 10 * acc_rows * _LANES * 4          # acc + f32 chunk temps
                         + (4 << 20))                          # margin
        vmem_limit = min(max(vmem_limit, 16 << 20), 48 << 20)

        shard_sem = pltpu.CORE_PARALLEL if n_shards > 1 else pltpu.ARBITRARY

        return pl.pallas_call(
            kernel,
            out_shape=jax.ShapeDtypeStruct((n_shards, 1), jnp.float32),
            grid_spec=pltpu.PrefetchScalarGridSpec(
                num_scalar_prefetch=0,
                grid=(n_shards, blocks_per_shard),
                in_specs=[
                    pl.BlockSpec((tile_rows, _LANES), in_map),
                    pl.BlockSpec((tile_rows, _LANES), in_map),
                ],
                out_specs=pl.BlockSpec(
                    (1, 1), lambda pidx, iidx: (pidx, 0),
                    memory_space=pltpu.MemorySpace.SMEM),
                scratch_shapes=[pltpu.VMEM((acc_rows, _LANES), jnp.float32)],
            ),
            compiler_params=pltpu.CompilerParams(
                dimension_semantics=(shard_sem, pltpu.ARBITRARY),
                vmem_limit_bytes=vmem_limit,
            ),
        )(x2, y2)

    try:
        partials = launch(shards)
    except Exception:
        if shards == 1:
            raise
        # Explicit core split unsupported here -> fall back to a single shard.
        partials = launch(1)

    return jnp.sum(partials, dtype=jnp.float32)


def rmse_loss(x, y):
    """Pallas implementation of torch.sqrt(nn.MSELoss()(x, y)) (mean over all elems)."""
    assert x.shape == y.shape, "x and y must have the same shape"
    n_total = int(x.size)
    if n_total == 0:
        # torch.sqrt(MSELoss) on empty tensors yields NaN.
        return jnp.float32(jnp.nan)

    xf = jnp.reshape(x, (-1,))
    yf = jnp.reshape(y, (-1,))
    rows = n_total // _LANES
    rem = n_total - rows * _LANES

    total = jnp.float32(0.0)

    if rows > 0:
        n_main = rows * _LANES
        # Prefix slice only for ragged sizes; the aligned common case is a
        # zero-copy (bitcast) reshape -- no jnp.pad anywhere.
        x_main = xf if rem == 0 else xf[:n_main]
        y_main = yf if rem == 0 else yf[:n_main]
        x2 = x_main.reshape(rows, _LANES)
        y2 = y_main.reshape(rows, _LANES)
        total = total + _rmse_sum_sq(x2, y2, rows)

    if rem > 0:
        # <128-element lane tail: trivial JAX epilogue.
        xt = xf[rows * _LANES:].astype(jnp.float32)
        yt = yf[rows * _LANES:].astype(jnp.float32)
        dt = xt - yt
        total = total + jnp.sum(dt * dt)

    return jnp.sqrt(total / jnp.float32(n_total))


if __name__ == "__main__":
    key = jax.random.PRNGKey(0)
    kx, ky = jax.random.split(key)
    # Small NCHW-shaped example inputs (RMSELoss takes predictions + targets).
    x = jax.random.normal(kx, (2, 4, 16, 16), dtype=jnp.float32)
    y = jax.random.normal(ky, (2, 4, 16, 16), dtype=jnp.float32)

    loss = rmse_loss(x, y)
    jax.block_until_ready(loss)

    # Reference check (plain JAX).
    ref = jnp.sqrt(jnp.mean((x - y) ** 2))
    assert jnp.allclose(loss, ref, rtol=1e-5, atol=1e-6), (loss, ref)

    print("KERNEL_OK")
</pallas_src>

<mosaic_0001>
module attributes {stable_mosaic.version = 11 : i64} {
  func.func @_rmse_partial_kernel(%arg0: i32, %arg1: i32, %arg2: memref<16x128xf32, #tpu.memory_space<vmem>>, %arg3: memref<16x128xf32, #tpu.memory_space<vmem>>, %arg4: memref<1x1xf32, #tpu.memory_space<smem>>, %arg5: memref<16x128xf32, #tpu.memory_space<vmem>>) attributes {dimension_semantics = [#tpu.dimension_semantics<arbitrary>, #tpu.dimension_semantics<arbitrary>], iteration_bounds = array<i64: 1, 1>, scalar_prefetch = 0 : i64, scratch_operands = 1 : i64, tpu.core_type = #tpu.core_type<tc>, window_params = [{transform_indices = @transform_0, window_bounds = array<i64: 16, 128>}, {transform_indices = @transform_1, window_bounds = array<i64: 16, 128>}, {transform_indices = @transform_2, window_bounds = array<i64: 1, 1>}]} {
    %c0_i32 = arith.constant 0 : i32
    %0 = arith.cmpi eq, %arg1, %c0_i32 : i32
    %1 = arith.extui %0 : i1 to i32
    %c0_i32_0 = arith.constant 0 : i32
    %2 = arith.cmpi ne, %1, %c0_i32_0 : i32
    scf.if %2 {
      %cst = arith.constant 0.000000e+00 : f32
      %13 = vector.broadcast %cst : f32 to vector<16x128xf32>
      %c0_10 = arith.constant 0 : index
      %c0_11 = arith.constant 0 : index
      %14 = vector.load %arg5[%c0_10, %c0_11] : memref<16x128xf32, #tpu.memory_space<vmem>>, vector<16x128xf32>
      tpu.vector_store %arg5[%c0_10, %c0_11], %13 {strides = array<i32>} : memref<16x128xf32, #tpu.memory_space<vmem>>, vector<16x128xf32>,
    } else {
    }
    %c0 = arith.constant 0 : index
    %c0_1 = arith.constant 0 : index
    %3 = vector.load %arg2[%c0, %c0_1] : memref<16x128xf32, #tpu.memory_space<vmem>>, vector<16x128xf32>
    %c0_2 = arith.constant 0 : index
    %c0_3 = arith.constant 0 : index
    %4 = vector.load %arg3[%c0_2, %c0_3] : memref<16x128xf32, #tpu.memory_space<vmem>>, vector<16x128xf32>
    %5 = arith.subf %3, %4 : vector<16x128xf32>
    %6 = arith.mulf %5, %5 : vector<16x128xf32>
    %c0_4 = arith.constant 0 : index
    %c0_5 = arith.constant 0 : index
    %7 = vector.load %arg5[%c0_4, %c0_5] : memref<16x128xf32, #tpu.memory_space<vmem>>, vector<16x128xf32>
    %8 = arith.addf %7, %6 : vector<16x128xf32>
    %c0_6 = arith.constant 0 : index
    %c0_7 = arith.constant 0 : index
    %9 = vector.load %arg5[%c0_6, %c0_7] : memref<16x128xf32, #tpu.memory_space<vmem>>, vector<16x128xf32>
    tpu.vector_store %arg5[%c0_6, %c0_7], %8 {strides = array<i32>} : memref<16x128xf32, #tpu.memory_space<vmem>>, vector<16x128xf32>,
    %c0_i32_8 = arith.constant 0 : i32
    %10 = arith.cmpi eq, %arg1, %c0_i32_8 : i32
    %11 = arith.extui %10 : i1 to i32
    %c0_i32_9 = arith.constant 0 : i32
    %12 = arith.cmpi ne, %11, %c0_i32_9 : i32
    scf.if %12 {
      %c0_10 = arith.constant 0 : index
      %c0_11 = arith.constant 0 : index
      %13 = vector.load %arg5[%c0_10, %c0_11] : memref<16x128xf32, #tpu.memory_space<vmem>>, vector<16x128xf32>
      %14 = vector.shape_cast %13 : vector<16x128xf32> to vector<1x16x128xf32>
      %cst = arith.constant dense<0.000000e+00> : vector<1xf32>
      %15 = vector.multi_reduction <add>, %14, %cst [1, 2] : vector<1x16x128xf32> to vector<1xf32>
      %16 = vector.shape_cast %15 : vector<1xf32> to vector<1x1x1xf32>
      %17 = vector.extract %16[0, 0, 0] : f32 from vector<1x1x1xf32>
      %c0_12 = arith.constant 0 : index
      %c0_13 = arith.constant 0 : index
      %18 = memref.load %arg4[%c0_12, %c0_13] : memref<1x1xf32, #tpu.memory_space<smem>>
      memref.store %17, %arg4[%c0_12, %c0_13] : memref<1x1xf32, #tpu.memory_space<smem>>
    } else {
    }
    return
  }
  func.func @transform_0(%arg0: i32, %arg1: i32) -> (i32, i32) {
    %c1_i32 = arith.constant 1 : i32
    %0 = arith.muli %arg0, %c1_i32 : i32
    %1 = arith.addi %0, %arg1 : i32
    %c0_i32 = arith.constant 0 : i32
    %2 = arith.minsi %1, %c0_i32 : i32
    %c0_i32_0 = arith.constant 0 : i32
    %c0_i32_1 = arith.constant 0 : i32
    return %2, %c0_i32_0 : i32, i32
  }
  func.func @transform_1(%arg0: i32, %arg1: i32) -> (i32, i32) {
    %c1_i32 = arith.constant 1 : i32
    %0 = arith.muli %arg0, %c1_i32 : i32
    %1 = arith.addi %0, %arg1 : i32
    %c0_i32 = arith.constant 0 : i32
    %2 = arith.minsi %1, %c0_i32 : i32
    %c0_i32_0 = arith.constant 0 : i32
    %c0_i32_1 = arith.constant 0 : i32
    return %2, %c0_i32_0 : i32, i32
  }
  func.func @transform_2(%arg0: i32, %arg1: i32) -> (i32, i32) {
    %c0_i32 = arith.constant 0 : i32
    %c0_i32_0 = arith.constant 0 : i32
    return %arg0, %c0_i32 : i32, i32
  }
}

</mosaic_0001>

<bundles_post_ra>
// kernel: tpu_custom_call.1
= control target key start
LH: loop header
LB: loop body
LE: loop exit
PB: predicated region body
PF: predicated region fallthrough
CT: control target
= control target key end

     0   :  { %7 = vsyncpa [#allocation4], 0  ;;  %s239_s0 = inlined_call_operand.hbm [shape: f32[16,128], index: 0, kind: input, shape index: {}]   ;;  %s240_s1 = inlined_call_operand.hbm [shape: f32[16,128], index: 1, kind: input, shape index: {}]   ;;  %s241_s2 = inlined_call_operand.hbm [shape: f32[1,1], index: 2, kind: output, shape index: {}]  }
   0x1   :  { %8 = vsyncpa [#allocation7], 0 }
   0x2   :  { %9 = vsyncpa [#allocation5], 0  ;;  %s183_s9 = smov [#allocation3]   ;;  %s123_s13 = scalar_lea.hbm %s239_s0, 256 }
   0x3   :  { %s21_s10 = sshll.u32 %s183_s9, 4  ;;  %p124_p0 = scmp.ne.s32.totalorder %s239_s0, %s123_s13  ;;  %s22_s10 = int_to_ptr.vmem [resolvable:$true] %s21_s10 }
   0x4   :  { %p127_p1 = scmp.lt.u32.totalorder %s123_s13, %s239_s0 }
   0x6   :  { %p129_p2 = pnand %p127_p1, %p124_p0 }
   0x8   :  { %132 = shalt.err (!%p129_p2)
}
   0x9   :  { %s133_s18 = scalar_lea.vmem %s22_s10, 256  ;;  %p138_p4 = scmp.lt.s32.totalorder %s22_s10, %s22_s10 }
   0xa   :  { %p134_p3 = scmp.ne.s32.totalorder %s22_s10, %s133_s18  ;;  %p139_p5 = scmp.lt.s32.totalorder %s133_s18, %s133_s18 }
   0xc   :  { %p140_p6 = por %p139_p5, %p138_p4 }
   0xe   :  { %p141_p7 = pnand %p140_p6, %p134_p3 }
  0x10   :  { %144 = shalt.err (!%p141_p7)
}
  0x11   :  { %s184_s19 = smov 128   ;;  %s185_s20 = smov 8  }
  0x12   :  { %27 = dma.hbm_to_vmem [thread:$0]  %s239_s0, 256, %s22_s10, [#allocation4], %s184_s19, %s184_s19, %s185_s20  }
  0x13   :  { %s186_s23 = smov [#allocation6]   ;;  %s145_s27 = scalar_lea.hbm %s240_s1, 256 }
  0x14   :  { %s39_s24 = sshll.u32 %s186_s23, 4  ;;  %p146_p8 = scmp.ne.s32.totalorder %s240_s1, %s145_s27  ;;  %s40_s24 = int_to_ptr.vmem [resolvable:$true] %s39_s24 }
  0x15   :  { %p149_p9 = scmp.lt.u32.totalorder %s145_s27, %s240_s1 }
  0x17   :  { %p151_p10 = pnand %p149_p9, %p146_p8 }
  0x19   :  { %154 = shalt.err (!%p151_p10)
}
  0x1a   :  { %s155_s4 = scalar_lea.vmem %s40_s24, 256  ;;  %p160_p12 = scmp.lt.s32.totalorder %s40_s24, %s40_s24 }
  0x1b   :  { %p156_p11 = scmp.ne.s32.totalorder %s40_s24, %s155_s4  ;;  %p161_p13 = scmp.lt.s32.totalorder %s155_s4, %s155_s4 }
  0x1d   :  { %p162_p0 = por %p161_p13, %p160_p12 }
  0x1f   :  { %p163_p1 = pnand %p162_p0, %p156_p11 }
  0x21   :  { %166 = shalt.err (!%p163_p1)
}
  0x22   :  { %45 = dma.hbm_to_vmem [thread:$0]  %s240_s1, 256, %s40_s24, [#allocation7], %s184_s19, %s184_s19, %s185_s20  }
  0x23   :  { %177 = dma.done.wait [#allocation4], 256  }
  0x24   :  { %178 = vsyncadd [#allocation4], 4294967040 }
  0x25   :  { %179 = dma.done.wait [#allocation7], 256  }
  0x26   :  { %180 = vsyncadd [#allocation7], 4294967040  ;;  %v66_v0 = vld [vmem:[#allocation3] sm:$0xff]  ;;  %v67_v1 = vld [vmem:[#allocation3 + $0x8] sm:$0xff]  ;;  %s167_s8 = scalar_lea.hbm %s241_s2, 16 }
  0x27   :  { %v68_v2 = vld [vmem:[#allocation6] sm:$0xff]  ;;  %v69_v3 = vld [vmem:[#allocation6 + $0x8] sm:$0xff]  ;;  %p168_p2 = scmp.ne.s32.totalorder %s241_s2, %s167_s8  ;;  %p171_p3 = scmp.lt.u32.totalorder %s167_s8, %s241_s2 }
  0x28   :  { %v70_v4 = vsub.f32 %v66_v0, %v68_v2  ;;  %v71_v5 = vsub.f32 %v67_v1, %v69_v3 }
  0x29   :  { %p173_p4 = pnand %p171_p3, %p168_p2 }
  0x2a   :  { %v72_v6 = vmul.f32 %v70_v4, %v70_v4  ;;  %v73_v7 = vmul.f32 %v71_v5, %v71_v5 }
  0x2c   :  { %v85_v8 = vadd.f32 %v73_v7, %v72_v6 }
  0x2e   :  { %86 = vadd.xlane.f32.xlu0 %v85_v8 }
  0xbb   :  { %v87_v9 = vpop.xlane.xlu0 %86 }
  0xbc   :  { %v88_v10 = vrot.slane %v87_v9, 4 }
  0xbe   :  { %v89_v11 = vadd.f32 %v88_v10, %v87_v9 }
  0xc0   :  { %v90_v12 = vrot.slane %v89_v11, 2 }
  0xc2   :  { %v91_v13 = vadd.f32 %v90_v12, %v89_v11 }
  0xc4   :  { %v92_v14 = vrot.slane %v91_v13, 1 }
  0xc6   :  { %v93_v15 = vadd.f32 %v92_v14, %v91_v13 }
  0xc8   :  { %116 = vpush %v93_v15 }
  0xf9   :  { %s117_s1 = spop %116 }
  0xfa   :  { %96 = sst [smem:[#allocation8]] %s117_s1 }
  0xfb   :  { %176 = shalt.err (!%p173_p4)
}
  0xfc   :  { %s187_s13 = smov [#allocation8]  }
  0xfd   :  { %104 = dma.smem_to_hbm %s187_s13, 16, %s241_s2, [#allocation5]  }
  0xfe   :  { %181 = dma.done.wait [#allocation5], 16  }
  0xff   :  { %182 = vsyncadd [#allocation5], 4294967280 }
 0x100   :  { %108 = sfence }
 0x101   :  { %109 = vsyncpa [#allocation4], 1 }
 0x102   :  { %110 = vsyncpa [#allocation7], 1 }
 0x103   :  { %111 = vsyncpa [#allocation5], 1 }

</bundles_post_ra>
